<compile_context>
chip_gen: v6e
topology: v6e:2x2x1
jax: 0.10.0
libtpu: 0.0.40
codegen_flags: <defaults>
</compile_context>

<pallas_src>
import functools
import math

import jax
import jax.numpy as jnp
from jax.experimental import pallas as pl
from jax.experimental.pallas import tpu as pltpu

_BN_EPS = 1e-5
ACT_NONE, ACT_RELU, ACT_SIGMOID = 0, 1, 2
_VMEM_LIMIT = 48 * 1024 * 1024


def _detect_v7x():
    try:
        return "v7" in jax.devices()[0].device_kind.lower()
    except Exception:
        return False


_IS_V7X = _detect_v7x()


def _rup(x, m):
    return ((x + m - 1) // m) * m


def _tile_full_or_div(dim, cap, align):
    """Tile for `dim`: full dim if <= cap, else largest divisor that is a
    multiple of `align` and <= cap; pad only as a last resort."""
    if dim <= cap:
        return dim, dim
    t = (cap // align) * align
    while t >= align:
        if dim % t == 0:
            return t, dim
        t -= align
    pdim = _rup(dim, align)
    t = (cap // align) * align
    while t >= align:
        if pdim % t == 0:
            return t, pdim
        t -= align
    return align, _rup(dim, align)


def _largest_divisor_le(n, cap):
    for d in range(min(cap, n), 0, -1):
        if n % d == 0:
            return d
    return 1


# ----------------------------------------------------------------------------
# Fused GEMM kernels:  out = act(sum_t A_t @ B_t + bias [+ residual])
# ----------------------------------------------------------------------------
def _epilogue(y, c_ref, r_ref, act, out_dtype):
    y = y + c_ref[...]
    if r_ref is not None:
        y = y + r_ref[...].astype(jnp.float32)
    if act == ACT_RELU:
        y = jnp.maximum(y, 0.0)
    elif act == ACT_SIGMOID:
        y = jax.nn.sigmoid(y)
    return y.astype(out_dtype)


def _mm_kernel_1k(*refs, n_a, has_res, act):
    a_refs = refs[0:n_a]
    w_refs = refs[n_a:2 * n_a]
    c_ref = refs[2 * n_a]
    r_ref = refs[2 * n_a + 1] if has_res else None
    o_ref = refs[-1]
    acc = jnp.dot(a_refs[0][...], w_refs[0][...],
                  preferred_element_type=jnp.float32)
    for t in range(1, n_a):
        acc = acc + jnp.dot(a_refs[t][...], w_refs[t][...],
                            preferred_element_type=jnp.float32)
    o_ref[...] = _epilogue(acc, c_ref, r_ref, act, o_ref.dtype)


def _mm_kernel_mk(*refs, n_a, has_res, act):
    a_refs = refs[0:n_a]
    w_refs = refs[n_a:2 * n_a]
    c_ref = refs[2 * n_a]
    r_ref = refs[2 * n_a + 1] if has_res else None
    o_ref = refs[-2]
    acc_ref = refs[-1]
    k = pl.program_id(2)

    @pl.when(k == 0)
    def _():
        acc_ref[...] = jnp.zeros_like(acc_ref)

    part = jnp.dot(a_refs[0][...], w_refs[0][...],
                   preferred_element_type=jnp.float32)
    for t in range(1, n_a):
        part = part + jnp.dot(a_refs[t][...], w_refs[t][...],
                              preferred_element_type=jnp.float32)
    acc_ref[...] += part

    @pl.when(k == pl.num_programs(2) - 1)
    def _():
        o_ref[...] = _epilogue(acc_ref[...], c_ref, r_ref, act, o_ref.dtype)


@functools.partial(jax.jit, static_argnames=("act", "out_dtype"))
def fused_matmul(a_list, b_list, bias, residual=None, *, act=ACT_NONE,
                 out_dtype=jnp.bfloat16):
    """act(sum_t a_t @ b_t + bias[col] [+ residual]); bf16 MXU, f32 accumulate."""
    n_a = len(a_list)
    M = a_list[0].shape[0]
    N = b_list[0].shape[1]
    Ks = [a.shape[1] for a in a_list]

    tm, Mp = _tile_full_or_div(M, 512, 8)
    tn, Np = _tile_full_or_div(N, 512, 128)
    multi_k = max(Ks) > 1024
    if multi_k:
        tk, Kp = _tile_full_or_div(max(Ks), 1024, 128)
        Kps = [Kp] * n_a
    else:
        Kps = list(Ks)

    # dual-TensorCore chips want >=2 output tiles; single-TC chips do not.
    if _IS_V7X and (Mp // tm) * (Np // tn) < 2 and tn % 256 == 0:
        tn //= 2

    a_ops, b_ops = [], []
    for t in range(n_a):
        a = a_list[t].astype(jnp.bfloat16)
        b = b_list[t].astype(jnp.bfloat16)
        if (Mp, Kps[t]) != a.shape:
            a = jnp.pad(a, ((0, Mp - M), (0, Kps[t] - Ks[t])))
        if (Kps[t], Np) != b.shape:
            b = jnp.pad(b, ((0, Kps[t] - Ks[t]), (0, Np - N)))
        a_ops.append(a)
        b_ops.append(b)
    c = bias.astype(jnp.float32).reshape(1, N)
    if Np != N:
        c = jnp.pad(c, ((0, 0), (0, Np - N)))
    has_res = residual is not None
    if has_res:
        r = residual.astype(jnp.bfloat16)
        if (Mp, Np) != r.shape:
            r = jnp.pad(r, ((0, Mp - M), (0, Np - N)))

    flops = 2 * M * sum(Ks) * N
    bytes_acc = 2 * (M * sum(Ks) + sum(Ks) * N + (2 if has_res else 1) * M * N)
    cost = pl.CostEstimate(flops=int(flops), transcendentals=0,
                           bytes_accessed=int(bytes_acc))

    if not multi_k:
        in_specs = ([pl.BlockSpec((tm, Kps[t]), lambda i, j: (i, 0))
                     for t in range(n_a)] +
                    [pl.BlockSpec((Kps[t], tn), lambda i, j: (0, j))
                     for t in range(n_a)] +
                    [pl.BlockSpec((1, tn), lambda i, j: (0, j))])
        inputs = a_ops + b_ops + [c]
        if has_res:
            in_specs.append(pl.BlockSpec((tm, tn), lambda i, j: (i, j)))
            inputs.append(r)
        out = pl.pallas_call(
            functools.partial(_mm_kernel_1k, n_a=n_a, has_res=has_res, act=act),
            out_shape=jax.ShapeDtypeStruct((Mp, Np), out_dtype),
            grid=(Mp // tm, Np // tn),
            in_specs=in_specs,
            out_specs=pl.BlockSpec((tm, tn), lambda i, j: (i, j)),
            compiler_params=pltpu.CompilerParams(
                dimension_semantics=("parallel", "parallel"),
                vmem_limit_bytes=_VMEM_LIMIT),
            cost_estimate=cost,
        )(*inputs)
    else:
        in_specs = ([pl.BlockSpec((tm, tk), lambda i, j, k: (i, k))
                     for _ in range(n_a)] +
                    [pl.BlockSpec((tk, tn), lambda i, j, k: (k, j))
                     for _ in range(n_a)] +
                    [pl.BlockSpec((1, tn), lambda i, j, k: (0, j))])
        inputs = a_ops + b_ops + [c]
        if has_res:
            in_specs.append(pl.BlockSpec((tm, tn), lambda i, j, k: (i, j)))
            inputs.append(r)
        out = pl.pallas_call(
            functools.partial(_mm_kernel_mk, n_a=n_a, has_res=has_res, act=act),
            out_shape=jax.ShapeDtypeStruct((Mp, Np), out_dtype),
            grid=(Mp // tm, Np // tn, Kp // tk),
            in_specs=in_specs,
            out_specs=pl.BlockSpec((tm, tn), lambda i, j, k: (i, j)),
            scratch_shapes=[pltpu.VMEM((tm, tn), jnp.float32)],
            compiler_params=pltpu.CompilerParams(
                dimension_semantics=("parallel", "parallel", "arbitrary"),
                vmem_limit_bytes=_VMEM_LIMIT),
            cost_estimate=cost,
        )(*inputs)
    if (Mp, Np) != (M, N):
        out = out[:M, :N]
    return out


# ----------------------------------------------------------------------------
# Implicit-GEMM stride-1 k x k conv kernel (no HBM im2col):
#   out = act( sum_{dy,dx} x_pad[.., r+dy, c+dx, :] @ W[(dy,dx)] + bias [+ res] )
# ----------------------------------------------------------------------------
def _conv_s1_kernel(*refs, nrows, kk, th, wo, act, has_res):
    rows = refs[:nrows]
    w_ref = refs[nrows]
    c_ref = refs[nrows + 1]
    r_ref = refs[nrows + 2] if has_res else None
    o_ref = refs[-1]
    cin = rows[0].shape[-1]
    cout = o_ref.shape[-1]
    band = jnp.concatenate([r[...] for r in rows], axis=1)[0]   # (nrows, Wp, Cin)
    acc = jnp.zeros((th * wo, cout), jnp.float32)
    for dy in range(kk):
        for dx in range(kk):
            a = band[dy:dy + th, dx:dx + wo, :].reshape(th * wo, cin)
            wk = w_ref[(dy * kk + dx) * cin:(dy * kk + dx + 1) * cin, :]
            acc = acc + jnp.dot(a, wk, preferred_element_type=jnp.float32)
    y = acc + c_ref[...]
    if has_res:
        y = y + r_ref[...].reshape(th * wo, cout).astype(jnp.float32)
    if act == ACT_RELU:
        y = jnp.maximum(y, 0.0)
    o_ref[...] = y.reshape(1, th, wo, cout).astype(o_ref.dtype)


@functools.partial(jax.jit, static_argnames=("kk", "pads", "act"))
def conv_s1_fused(x, wmat, bias, residual=None, *, kk, pads, act=ACT_NONE):
    """Stride-1 kk x kk conv, NHWC, weight rows ordered (dy, dx, cin)."""
    N, H, W, C = x.shape
    pt, pb, pleft, pright = pads
    Cout = wmat.shape[1]
    xp = x.astype(jnp.bfloat16)
    xp = jnp.pad(xp, ((0, 0), (pt, pb), (pleft, pright), (0, 0)))
    Hp, Wp = H + pt + pb, W + pleft + pright
    Ho, Wo = Hp - kk + 1, Wp - kk + 1
    th = _largest_divisor_le(Ho, 8)
    nrows = th + kk - 1
    has_res = residual is not None

    def row_spec(j):
        return pl.BlockSpec((1, 1, Wp, C),
                            lambda n, t, j=j: (n, t * th + j, 0, 0))

    in_specs = [row_spec(j) for j in range(nrows)]
    in_specs.append(pl.BlockSpec((kk * kk * C, Cout), lambda n, t: (0, 0)))
    in_specs.append(pl.BlockSpec((1, Cout), lambda n, t: (0, 0)))
    inputs = [xp] * nrows + [wmat, bias.astype(jnp.float32).reshape(1, Cout)]
    if has_res:
        in_specs.append(pl.BlockSpec((1, th, Wo, Cout),
                                     lambda n, t: (n, t, 0, 0)))
        inputs.append(residual.astype(jnp.bfloat16))

    flops = 2 * N * Ho * Wo * kk * kk * C * Cout
    bytes_acc = 2 * (nrows * N * (Ho // th) * Wp * C + kk * kk * C * Cout
                     + (2 if has_res else 1) * N * Ho * Wo * Cout)
    out = pl.pallas_call(
        functools.partial(_conv_s1_kernel, nrows=nrows, kk=kk, th=th, wo=Wo,
                          act=act, has_res=has_res),
        out_shape=jax.ShapeDtypeStruct((N, Ho, Wo, Cout), jnp.bfloat16),
        grid=(N, Ho // th),
        in_specs=in_specs,
        out_specs=pl.BlockSpec((1, th, Wo, Cout), lambda n, t: (n, t, 0, 0)),
        compiler_params=pltpu.CompilerParams(
            dimension_semantics=("parallel", "parallel"),
            vmem_limit_bytes=_VMEM_LIMIT),
        cost_estimate=pl.CostEstimate(flops=int(flops), transcendentals=0,
                                      bytes_accessed=int(bytes_acc)),
    )(*inputs)
    return out


# ----------------------------------------------------------------------------
# Channel-attention gating kernel (lane-dense, gridded)
# ----------------------------------------------------------------------------
def _gate_kernel(x_ref, g_ref, o_ref):
    o_ref[...] = (x_ref[...].astype(jnp.float32) * g_ref[...]).astype(o_ref.dtype)


def _row_tile(rows, chans):
    cap = max(8, ((1 << 21) // max(chans, 1)) // 8 * 8)   # ~4 MiB bf16 blocks
    if rows % 8 == 0:
        t = min(cap, rows)
        t = max(8, t // 8 * 8)
        while t >= 8:
            if rows % t == 0:
                return t
            t -= 8
    return rows


@jax.jit
def channel_gate(x, att):
    """x: (N,H,W,C) * att: (N,C) broadcast over spatial."""
    N, H, W, C = x.shape
    R = H * W
    tr = _row_tile(R, C)
    xr = x.reshape(N, R, C)
    g = att.reshape(N, 1, C).astype(jnp.float32)
    y = pl.pallas_call(
        _gate_kernel,
        out_shape=jax.ShapeDtypeStruct((N, R, C), x.dtype),
        grid=(N, R // tr),
        in_specs=[pl.BlockSpec((1, tr, C), lambda n, r: (n, r, 0)),
                  pl.BlockSpec((1, 1, C), lambda n, r: (n, 0, 0))],
        out_specs=pl.BlockSpec((1, tr, C), lambda n, r: (n, r, 0)),
        compiler_params=pltpu.CompilerParams(
            dimension_semantics=("parallel", "parallel"),
            vmem_limit_bytes=_VMEM_LIMIT),
    )(xr, g)
    return y.reshape(N, H, W, C)


@jax.jit
def channel_attention(x, w, b):
    """AdaptiveAvgPool2d(1) -> 1x1 conv (+bias) -> sigmoid -> gate x."""
    # TODO(synk): the per-channel spatial mean could be fused into the
    # preceding GEMM epilogue; kept in XLA for now.
    N, H, W, C = x.shape
    pooled = jnp.mean(x.reshape(N, H * W, C).astype(jnp.float32), axis=1)
    att = jax.nn.sigmoid(pooled @ w + b)
    return channel_gate(x, att)


# ----------------------------------------------------------------------------
# Conv wrappers (NHWC, BN folded into weights, residual/act fused)
# ----------------------------------------------------------------------------
@functools.partial(jax.jit, static_argnames=("stride", "act", "out_dtype"))
def conv1x1_fused(x, wmat, bias, residual=None, *, stride=1, act=ACT_NONE,
                  out_dtype=jnp.bfloat16):
    N, H, W, C = x.shape
    xs = x if stride == 1 else x[:, ::stride, ::stride, :]
    Ho, Wo = xs.shape[1], xs.shape[2]
    a = xs.reshape(N * Ho * Wo, C)
    r2 = None if residual is None else residual.reshape(N * Ho * Wo, -1)
    y = fused_matmul([a], [wmat], bias, r2, act=act, out_dtype=out_dtype)
    return y.reshape(N, Ho, Wo, -1)


@functools.partial(jax.jit, static_argnames=("k", "stride", "pad", "act"))
def conv_im2col_fused(x, wmat, bias, residual=None, *, k, stride, pad,
                      act=ACT_NONE):
    # TODO(synk): XLA-materialized im2col; only used for the 7x7 stems (tiny C)
    # and the six stride-2 3x3 convs.
    N, H, W, C = x.shape
    Ho = (H + 2 * pad - k) // stride + 1
    Wo = (W + 2 * pad - k) // stride + 1
    xp = x if pad == 0 else jnp.pad(
        x, ((0, 0), (pad, pad), (pad, pad), (0, 0)))
    cols = [xp[:, i:i + stride * (Ho - 1) + 1:stride,
               j:j + stride * (Wo - 1) + 1:stride, :]
            for i in range(k) for j in range(k)]
    a = jnp.concatenate(cols, axis=-1).reshape(N * Ho * Wo, k * k * C)
    r2 = None if residual is None else residual.reshape(N * Ho * Wo, -1)
    y = fused_matmul([a], [wmat], bias, r2, act=act)
    return y.reshape(N, Ho, Wo, -1)


def conv_bn(x, p, act=ACT_NONE, residual=None):
    k, s, pad = p["k"], p["stride"], p["pad"]
    if k == 1:
        return conv1x1_fused(x, p["wmat"], p["bias"], residual, stride=s, act=act)
    if k == 3 and s == 1:
        return conv_s1_fused(x, p["wmat"], p["bias"], residual,
                             kk=3, pads=(pad, pad, pad, pad), act=act)
    return conv_im2col_fused(x, p["wmat"], p["bias"], residual,
                             k=k, stride=s, pad=pad, act=act)


def conv_down_pair(x1, x2, p):
    """1x1 conv over channel-concat(x1, x2) without materializing the concat."""
    N, H, W, C1 = x1.shape
    C2 = x2.shape[-1]
    a1 = x1.reshape(N * H * W, C1)
    a2 = x2.reshape(N * H * W, C2)
    b1, b2 = p["wmat"][:C1], p["wmat"][C1:]
    y = fused_matmul([a1, a2], [b1, b2], p["bias"], act=ACT_NONE)
    return y.reshape(N, H, W, -1)


def pixel_shuffle2(y, cout):
    # TODO(synk): the de-interleave is still one XLA transpose pass; it could
    # be folded into the consuming layer's row construction.
    N, H, W, _ = y.shape
    y = y.reshape(N, H, W, 2, 2, cout).transpose(0, 1, 3, 2, 4, 5)
    return y.reshape(N, 2 * H, 2 * W, cout)


@jax.jit
def maxpool3x3s2(x):
    # TODO(synk): overlapping 3x3/s2 windows are not rectangular Pallas blocks;
    # fused shifted-maximum is left to XLA (tiny tensor, runs twice).
    N, H, W, C = x.shape
    Ho = (H + 2 - 3) // 2 + 1
    Wo = (W + 2 - 3) // 2 + 1
    xp = jnp.pad(x, ((0, 0), (1, 1), (1, 1), (0, 0)),
                 constant_values=-jnp.inf)
    out = None
    for i in range(3):
        for j in range(3):
            v = xp[:, i:i + 2 * (Ho - 1) + 1:2, j:j + 2 * (Wo - 1) + 1:2, :]
            out = v if out is None else jnp.maximum(out, v)
    return out


# ----------------------------------------------------------------------------
# Parameters
# ----------------------------------------------------------------------------
class ParamGen:
    def __init__(self, seed=0):
        self._key = jax.random.PRNGKey(seed)
        self._n = 0

    def _next(self):
        self._n += 1
        return jax.random.fold_in(self._key, self._n)

    def conv_w(self, cin, cout, k):
        n = k * k * cout
        return math.sqrt(2.0 / n) * jax.random.normal(
            self._next(), (cout, cin, k, k), jnp.float32)

    def convT_w(self, cin, cout, k):
        n = k * k * cout
        return math.sqrt(2.0 / n) * jax.random.normal(
            self._next(), (cin, cout, k, k), jnp.float32)


def fold_bn(c, gamma=None, beta=None, mean=None, var=None):
    # TODO(synk): eval-mode BN (running stats); torch default is train mode.
    gamma = jnp.ones((c,), jnp.float32) if gamma is None else gamma
    beta = jnp.zeros((c,), jnp.float32) if beta is None else beta
    mean = jnp.zeros((c,), jnp.float32) if mean is None else mean
    var = jnp.ones((c,), jnp.float32) if var is None else var
    scale = gamma / jnp.sqrt(var + _BN_EPS)
    return scale, beta - mean * scale


def conv_params(pg, cin, cout, k, stride, pad, bn=True):
    w = pg.conv_w(cin, cout, k)                              # (cout,cin,k,k)
    if bn:
        scale, bias = fold_bn(cout)
    else:
        scale = jnp.ones((cout,), jnp.float32)
        bias = jnp.zeros((cout,), jnp.float32)
    wmat = (w.transpose(2, 3, 1, 0).reshape(k * k * cin, cout)
            * scale[None, :]).astype(jnp.bfloat16)           # BN scale folded
    return {"wmat": wmat, "k": k, "stride": stride, "pad": pad, "bias": bias}


def atten_params(pg, c):
    w = pg.conv_w(c, c, 1)
    return {"w": w.reshape(c, c).T.astype(jnp.float32),
            "b": jnp.zeros((c,), jnp.float32)}


def phase_deconv3_wmat(w, scale, bias):
    """ConvTranspose2d(k=3,s=2,p=1,op=1) as a (4*Cin, 4*Cout) phase GEMM."""
    cin, cout = w.shape[0], w.shape[1]
    Wm = jnp.zeros((4 * cin, 4 * cout), jnp.float32)

    def put(Wm, ty, tx, dy, dx, a, b):
        return Wm.at[(ty * 2 + tx) * cin:(ty * 2 + tx + 1) * cin,
                     (dy * 2 + dx) * cout:(dy * 2 + dx + 1) * cout].set(
                         w[:, :, a, b])

    Wm = put(Wm, 0, 0, 0, 0, 1, 1)
    Wm = put(Wm, 0, 0, 0, 1, 1, 2)
    Wm = put(Wm, 0, 1, 0, 1, 1, 0)
    Wm = put(Wm, 0, 0, 1, 0, 2, 1)
    Wm = put(Wm, 1, 0, 1, 0, 0, 1)
    Wm = put(Wm, 0, 0, 1, 1, 2, 2)
    Wm = put(Wm, 0, 1, 1, 1, 2, 0)
    Wm = put(Wm, 1, 0, 1, 1, 0, 2)
    Wm = put(Wm, 1, 1, 1, 1, 0, 0)
    Wm = Wm * jnp.tile(scale, 4)[None, :]
    return Wm.astype(jnp.bfloat16), jnp.tile(bias, 4)


def make_bottleneck(pg, inplanes, planes, stride=1, downsample=False):
    p = {"conv1": conv_params(pg, inplanes, planes, 1, 1, 0),
         "conv2": conv_params(pg, planes, planes, 3, stride, 1),
         "conv3": conv_params(pg, planes, planes * 4, 1, 1, 0)}
    if downsample:
        p["ds"] = conv_params(pg, inplanes, planes * 4, 1, stride, 0)
    return p


def make_transbasic(pg, inplanes, planes, stride=1, upsample=None):
    p = {"upsample": upsample,
         "conv1": conv_params(pg, inplanes, inplanes, 3, 1, 1)}
    if upsample is not None and stride != 1:
        w = pg.convT_w(inplanes, planes, 3)                  # (Cin,Cout,3,3)
        s, b = fold_bn(planes)                               # bn2 folded
        wm, b4 = phase_deconv3_wmat(w, s, b)
        p["conv2_t"] = {"wmat": wm, "bias4": b4, "cout": planes}
    else:
        p["conv2"] = conv_params(pg, inplanes, planes, 3, stride, 1)
    if upsample == "deconv":
        w = pg.convT_w(inplanes, planes, 2)                  # (Cin,Cout,2,2)
        s, b = fold_bn(planes)
        wm = (w.transpose(0, 2, 3, 1).reshape(inplanes, 4 * planes)
              * jnp.tile(s, 4)[None, :]).astype(jnp.bfloat16)
        p["up"] = {"wmat": wm, "bias4": jnp.tile(b, 4), "cout": planes}
    elif upsample == "conv":
        p["up"] = conv_params(pg, inplanes, planes, 1, 1, 0)
    return p


def init_acnet(seed=0, num_class=4):
    pg = ParamGen(seed)
    layers_cfg = [3, 4, 6, 3]
    P = {}

    def make_layer(inplanes, planes, blocks, stride=1):
        downsample = (stride != 1 or inplanes != planes * 4)
        bl = [make_bottleneck(pg, inplanes, planes, stride, downsample)]
        for _ in range(1, blocks):
            bl.append(make_bottleneck(pg, planes * 4, planes, 1, False))
        return bl, planes * 4

    # RGB encoder (ResNet-50)
    P["conv1"] = conv_params(pg, 3, 64, 7, 2, 3)
    inpl = 64
    P["layer1"], inpl = make_layer(inpl, 64, layers_cfg[0])
    P["layer2"], inpl = make_layer(inpl, 128, layers_cfg[1], 2)
    P["layer3"], inpl = make_layer(inpl, 256, layers_cfg[2], 2)
    P["layer4"], inpl = make_layer(inpl, 512, layers_cfg[3], 2)
    # Depth encoder (ResNet-50, 1-channel input)
    P["conv1_d"] = conv_params(pg, 1, 64, 7, 2, 3)
    inpl = 64
    P["layer1_d"], inpl = make_layer(inpl, 64, layers_cfg[0])
    P["layer2_d"], inpl = make_layer(inpl, 128, layers_cfg[1], 2)
    P["layer3_d"], inpl = make_layer(inpl, 256, layers_cfg[2], 2)
    P["layer4_d"], inpl = make_layer(inpl, 512, layers_cfg[3], 2)
    # Channel attention modules
    for name, c in [("atten_rgb_0", 64), ("atten_depth_0", 64),
                    ("atten_rgb_1", 256), ("atten_depth_1", 256),
                    ("atten_rgb_2", 512), ("atten_depth_2", 512),
                    ("atten_rgb_3", 1024), ("atten_depth_3", 1024),
                    ("atten_rgb_4", 2048), ("atten_depth_4", 2048)]:
        P[name] = atten_params(pg, c)
    # Agant layers (1x1 conv + BN + ReLU)
    for name, cin, cout in [("agant0", 64, 64), ("agant1", 256, 64),
                            ("agant2", 512, 128), ("agant3", 1024, 256),
                            ("agant4", 2048, 512)]:
        P[name] = conv_params(pg, cin, cout, 1, 1, 0)

    # Decoder transpose stacks
    def make_transpose(inplanes, planes, blocks, stride=1):
        if stride != 1:
            up = "deconv"
        elif inplanes != planes:
            up = "conv"
        else:
            up = None
        bl = []
        for _ in range(1, blocks):
            bl.append(make_transbasic(pg, inplanes, inplanes, 1, None))
        bl.append(make_transbasic(pg, inplanes, planes, stride, up))
        return bl, planes

    inpl = 512
    P["deconv1"], inpl = make_transpose(inpl, 256, 6, 2)
    P["deconv2"], inpl = make_transpose(inpl, 128, 4, 2)
    P["deconv3"], inpl = make_transpose(inpl, 64, 3, 2)
    P["deconv4"], inpl = make_transpose(inpl, 64, 3, 2)
    inpl = 64
    P["final_conv"], inpl = make_transpose(inpl, 64, 3)
    w = pg.convT_w(inpl, num_class, 2)                       # bias=True
    P["final_deconv"] = {"wmat": w.transpose(0, 2, 3, 1)
                         .reshape(inpl, 4 * num_class).astype(jnp.bfloat16),
                         "bias4": jnp.zeros((4 * num_class,), jnp.float32),
                         "cout": num_class}
    # 1x1 channel-reduction convs (no bias, no BN)
    for name, cin, cout in [("conv_down_0", 128, 64), ("conv_down_1", 512, 256),
                            ("conv_down_2", 1024, 512), ("conv_down_3", 2048, 1024),
                            ("conv_down_4", 4096, 2048), ("conv_down_5", 512, 256),
                            ("conv_down_6", 256, 128), ("conv_down_7", 128, 64),
                            ("conv_down_8", 128, 64)]:
        P[name] = conv_params(pg, cin, cout, 1, 1, 0, bn=False)
    return P


# ----------------------------------------------------------------------------
# Blocks / forward
# ----------------------------------------------------------------------------
def bottleneck_fwd(x, p):
    out = conv_bn(x, p["conv1"], act=ACT_RELU)
    out = conv_bn(out, p["conv2"], act=ACT_RELU)
    if "ds" in p:
        residual = conv_bn(x, p["ds"], act=ACT_NONE)
    else:
        residual = x
    # conv3 + bn3 + residual add + relu fused into one GEMM epilogue
    return conv_bn(out, p["conv3"], act=ACT_RELU, residual=residual)


def transbasic_fwd(x, p):
    out = conv_bn(x, p["conv1"], act=ACT_RELU)
    if "conv2_t" in p:
        # stride-2 block: deconv2x2 residual + 4-phase transposed conv, both in
        # (dy,dx,C) phase layout; single pixel-shuffle at the end.
        u = p["up"]
        N, H, W, C = x.shape
        res = fused_matmul([x.reshape(N * H * W, C)], [u["wmat"]], u["bias4"],
                           act=ACT_NONE).reshape(N, H, W, -1)
        c = p["conv2_t"]
        outp = conv_s1_fused(out, c["wmat"], c["bias4"], res,
                             kk=2, pads=(0, 1, 0, 1), act=ACT_RELU)
        return pixel_shuffle2(outp, c["cout"])
    if p["upsample"] == "conv":
        residual = conv_bn(x, p["up"], act=ACT_NONE)
    else:
        residual = x
    return conv_bn(out, p["conv2"], act=ACT_RELU, residual=residual)


def acnet_encoder(P, rgb, depth):
    rgb = conv_bn(rgb, P["conv1"], act=ACT_RELU)
    depth = conv_bn(depth, P["conv1_d"], act=ACT_RELU)
    m_rgb = channel_attention(rgb, P["atten_rgb_0"]["w"], P["atten_rgb_0"]["b"])
    m_depth = channel_attention(depth, P["atten_depth_0"]["w"],
                                P["atten_depth_0"]["b"])
    fuses = [conv_down_pair(m_rgb, m_depth, P["conv_down_0"])]
    m_rgb = maxpool3x3s2(m_rgb)
    m_depth = maxpool3x3s2(m_depth)
    for idx in range(1, 5):
        for blk in P[f"layer{idx}"]:
            m_rgb = bottleneck_fwd(m_rgb, blk)
        for blk in P[f"layer{idx}_d"]:
            m_depth = bottleneck_fwd(m_depth, blk)
        ar, ad = P[f"atten_rgb_{idx}"], P[f"atten_depth_{idx}"]
        m_rgb = channel_attention(m_rgb, ar["w"], ar["b"])
        m_depth = channel_attention(m_depth, ad["w"], ad["b"])
        fuses.append(conv_down_pair(m_rgb, m_depth, P[f"conv_down_{idx}"]))
    return fuses


def acnet_decoder(P, fuses):
    fuse0, fuse1, fuse2, fuse3, fuse4 = fuses

    def agant(name, x):
        return conv_bn(x, P[name], act=ACT_RELU)

    x = agant("agant4", fuse4)
    for blk in P["deconv1"]:
        x = transbasic_fwd(x, blk)
    x = conv_down_pair(x, agant("agant3", fuse3), P["conv_down_5"])
    for blk in P["deconv2"]:
        x = transbasic_fwd(x, blk)
    x = conv_down_pair(x, agant("agant2", fuse2), P["conv_down_6"])
    for blk in P["deconv3"]:
        x = transbasic_fwd(x, blk)
    x = conv_down_pair(x, agant("agant1", fuse1), P["conv_down_7"])
    for blk in P["deconv4"]:
        x = transbasic_fwd(x, blk)
    x = conv_down_pair(x, agant("agant0", fuse0), P["conv_down_8"])
    for blk in P["final_conv"]:
        x = transbasic_fwd(x, blk)
    fd = P["final_deconv"]
    N, H, W, C = x.shape
    y = fused_matmul([x.reshape(N * H * W, C)], [fd["wmat"]], fd["bias4"],
                     act=ACT_NONE, out_dtype=jnp.float32)
    y = pixel_shuffle2(y.reshape(N, H, W, -1), fd["cout"])
    return jnp.transpose(y, (0, 3, 1, 2))          # back to NCHW, float32


def acnet_forward(P, rgb, depth):
    # NCHW (PyTorch interface) -> NHWC internal (lane-dense channels)
    rgb = jnp.transpose(rgb, (0, 2, 3, 1)).astype(jnp.bfloat16)
    depth = jnp.transpose(depth, (0, 2, 3, 1)).astype(jnp.bfloat16)
    return acnet_decoder(P, acnet_encoder(P, rgb, depth))


# ----------------------------------------------------------------------------
if __name__ == "__main__":
    key = jax.random.PRNGKey(0)
    k_rgb, k_depth = jax.random.split(key)
    # smallest spatial size compatible with the 5-level encoder / decoder: 32
    rgb = jax.random.normal(k_rgb, (1, 3, 32, 32), jnp.float32)
    depth = jax.random.normal(k_depth, (1, 1, 32, 32), jnp.float32)

    params = init_acnet(seed=0, num_class=4)
    out = acnet_forward(params, rgb, depth)
    out = jax.block_until_ready(out)

    assert out.shape == (1, 4, 32, 32), out.shape
    assert bool(jnp.all(jnp.isfinite(out))), "non-finite output"
    print("KERNEL_OK")
</pallas_src>

<mosaic_0001>
module attributes {stable_mosaic.version = 11 : i64} {
  func.func @_mm_kernel_1k(%arg0: i32, %arg1: i32, %arg2: memref<256x147xbf16, #tpu.memory_space<vmem>>, %arg3: memref<147x64xbf16, #tpu.memory_space<vmem>>, %arg4: memref<1x64xf32, #tpu.memory_space<vmem>>, %arg5: memref<256x64xbf16, #tpu.memory_space<vmem>>) attributes {dimension_semantics = [#tpu.dimension_semantics<parallel>, #tpu.dimension_semantics<parallel>], iteration_bounds = array<i64: 1, 1>, scalar_prefetch = 0 : i64, scratch_operands = 0 : i64, tpu.core_type = #tpu.core_type<tc>, window_params = [{transform_indices = @transform_0, window_bounds = array<i64: 256, 147>}, {transform_indices = @transform_1, window_bounds = array<i64: 147, 64>}, {transform_indices = @transform_2, window_bounds = array<i64: 1, 64>}, {transform_indices = @transform_3, window_bounds = array<i64: 256, 64>}]} {
    %c0 = arith.constant 0 : index
    %c0_0 = arith.constant 0 : index
    %0 = vector.load %arg2[%c0, %c0_0] : memref<256x147xbf16, #tpu.memory_space<vmem>>, vector<256x147xbf16>
    %c0_1 = arith.constant 0 : index
    %c0_2 = arith.constant 0 : index
    %1 = vector.load %arg3[%c0_1, %c0_2] : memref<147x64xbf16, #tpu.memory_space<vmem>>, vector<147x64xbf16>
    %cst = arith.constant dense<0.000000e+00> : vector<256x64xf32>
    %2 = tpu.matmul %0, %1, %cst {dimension_numbers = #tpu.dot_dimension_numbers<[1], [0], [0], [1], [0, 0, 1, 1], [], []>} : vector<256x147xbf16>, vector<147x64xbf16>, vector<256x64xf32> -> vector<256x64xf32>
    %c0_3 = arith.constant 0 : index
    %c0_4 = arith.constant 0 : index
    %3 = vector.load %arg4[%c0_3, %c0_4] : memref<1x64xf32, #tpu.memory_space<vmem>>, vector<1x64xf32>
    %4 = vector.broadcast %3 : vector<1x64xf32> to vector<256x64xf32>
    %5 = arith.addf %2, %4 : vector<256x64xf32>
    %cst_5 = arith.constant 0.000000e+00 : f32
    %6 = vector.broadcast %cst_5 : f32 to vector<256x64xf32>
    %7 = arith.maximumf %5, %6 : vector<256x64xf32>
    %8 = arith.truncf %7 : vector<256x64xf32> to vector<256x64xbf16>
    %c0_6 = arith.constant 0 : index
    %c0_7 = arith.constant 0 : index
    %9 = vector.load %arg5[%c0_6, %c0_7] : memref<256x64xbf16, #tpu.memory_space<vmem>>, vector<256x64xbf16>
    tpu.vector_store %arg5[%c0_6, %c0_7], %8 {strides = array<i32>} : memref<256x64xbf16, #tpu.memory_space<vmem>>, vector<256x64xbf16>,
    return
  }
  func.func @transform_0(%arg0: i32, %arg1: i32) -> (i32, i32) {
    %c0_i32 = arith.constant 0 : i32
    %c0_i32_0 = arith.constant 0 : i32
    return %arg0, %c0_i32 : i32, i32
  }
  func.func @transform_1(%arg0: i32, %arg1: i32) -> (i32, i32) {
    %c0_i32 = arith.constant 0 : i32
    %c0_i32_0 = arith.constant 0 : i32
    return %c0_i32, %arg1 : i32, i32
  }
  func.func @transform_2(%arg0: i32, %arg1: i32) -> (i32, i32) {
    %c0_i32 = arith.constant 0 : i32
    %c0_i32_0 = arith.constant 0 : i32
    return %c0_i32, %arg1 : i32, i32
  }
  func.func @transform_3(%arg0: i32, %arg1: i32) -> (i32, i32) {
    %c0_i32 = arith.constant 0 : i32
    return %arg0, %arg1 : i32, i32
  }
}

</mosaic_0001>

<bundles_post_ra>
// kernel: fused_matmul.1
= control target key start
LH: loop header
LB: loop body
LE: loop exit
PB: predicated region body
PF: predicated region fallthrough
CT: control target
= control target key end

     0   :  { %v891_v0 = vmov 0   ;;  %vm274_vm0 = vcmask 154624   ;;  %vm323_vm1 = vcmask 1040384   ;;  %vm324_vm2 = vcmask 1041408   ;;  %s1220_s1 = inlined_call_operand.vmem [shape: bf16[147,64], index: 1, kind: input, shape index: {}]   ;;  %s1221_s0 = inlined_call_operand.vmem [shape: bf16[256,147], index: 0, kind: input, shape index: {}]   ;;  %s1222_s2 = inlined_call_operand.vmem [shape: f32[1,64], index: 2, kind: input, shape index: {}]   ;;  %s1223_s3 = inlined_call_operand.vmem [shape: bf16[256,64], index: 3, kind: output, shape index: {}]  }
   0x1   :  { %330 = vmatprep.subr.bf16.mxu0 %v891_v0  ;;  %811 = vmatprep.subr.bf16.mxu1 %v891_v0  ;;  %v833_v1 = vld [vmem:[%s1220_s1 + $0x38] sm:$0xff]   ;;  %v834_v2 = vld [vmem:[%s1220_s1 + $0x30] sm:$0xff]   ;;  %v835_v3 = vld [vmem:[%s1220_s1 + $0x28] sm:$0xff]   ;;  %v892_v10 = vmov 65535   ;;  %vm651_vm3 = vcmask 519168  }
   0x2   :  { %331 = vmatpush1.bf16.msra.mxu0 %v833_v1  ;;  %821 = vmatpush1.bf16.msra.mxu1 %v833_v1  ;;  %v836_v4 = vld [vmem:[%s1220_s1 + $0x20] sm:$0xff]   ;;  %v837_v7 = vld [vmem:[%s1220_s1 + $0x18] sm:$0xff]   ;;  %v838_v8 = vld [vmem:[%s1220_s1 + $0x10] sm:$0xff]   ;;  %v325_v11 = vsel %vm323_vm1, 4294967295, %v892_v10 }
   0x3   :  { %332 = vmatprep.subr.bf16.mxu0 %v891_v0  ;;  %812 = vmatprep.subr.bf16.mxu1 %v891_v0  ;;  %v845_v5 = vld [vmem:[%s1221_s0 + $0x4] ss:$8 sps:$4 sm:$0xff]   ;;  %v841_v13 = vld [vmem:[%s1220_s1 + $0x48] ss:$0 sps:$4 sm:$0x33]   ;;  %v326_v14 = vsel %vm324_vm2, %v325_v11, 0 }
   0x4   :  { %731 = vmatprep.mubr.msk.bf16.mxu0 %vm274_vm0, %v845_v5  ;;  %v848_v6 = vld [vmem:[%s1221_s0 + $0x84] ss:$8 sps:$4 sm:$0xff]   ;;  %v328_v15 = vand.u32 %v841_v13, %v326_v14  ;;  %v843_v17 = vld [vmem:[%s1221_s0] ss:$8 sps:$4 sm:$0xff]   ;;  %v849_v19 = vld [vmem:[%s1221_s0 + $0x14] ss:$8 sps:$4 sm:$0xff]  }
   0x5   :  { %739 = vmatprep.mubr.msk.bf16.mxu1 %vm274_vm0, %v848_v6  ;;  %v839_v9 = vld [vmem:[%s1220_s1 + $0x8] sm:$0xff]   ;;  %v840_v12 = vld [vmem:[%s1220_s1] sm:$0xff]   ;;  %v851_v20 = vld [vmem:[%s1221_s0 + $0x94] ss:$8 sps:$4 sm:$0xff]  }
   0x6   :  { %333 = vmatpush1.bf16.msra.mxu0 %v834_v2  ;;  %822 = vmatpush1.bf16.msra.mxu1 %v834_v2  ;;  %v842_v16 = vld [vmem:[%s1220_s1 + $0x40] sm:$0xff]   ;;  %v853_v21 = vld [vmem:[%s1221_s0 + $0x10] ss:$8 sps:$4 sm:$0xff]   ;;  %v861_v27 = vld [vmem:[%s1221_s0 + $0x34] ss:$8 sps:$4 sm:$0xff]  }
   0x7   :  { %334 = vmatprep.subr.bf16.mxu0 %v891_v0  ;;  %813 = vmatprep.subr.bf16.mxu1 %v891_v0  ;;  %v846_v18 = vld [vmem:[%s1221_s0 + $0x80] ss:$8 sps:$4 sm:$0xff]   ;;  %v854_v22 = vld [vmem:[%s1221_s0 + $0x90] ss:$8 sps:$4 sm:$0xff]   ;;  %v855_v23 = vld [vmem:[%s1221_s0 + $0x24] ss:$8 sps:$4 sm:$0xff]  }
   0x8   :  { %v857_v24 = vld [vmem:[%s1221_s0 + $0xa4] ss:$8 sps:$4 sm:$0xff]   ;;  %v859_v25 = vld [vmem:[%s1221_s0 + $0x20] ss:$8 sps:$4 sm:$0xff]   ;;  %v863_v28 = vld [vmem:[%s1221_s0 + $0xb4] ss:$8 sps:$4 sm:$0xff]  }
   0x9   :  { %v860_v26 = vld [vmem:[%s1221_s0 + $0xa0] ss:$8 sps:$4 sm:$0xff]   ;;  %v865_v29 = vld [vmem:[%s1221_s0 + $0x30] ss:$8 sps:$4 sm:$0xff]   ;;  %v867_v31 = vld [vmem:[%s1221_s0 + $0x44] ss:$8 sps:$4 sm:$0xff]  }
   0xa   :  { %335 = vmatpush1.bf16.msra.mxu0 %v835_v3  ;;  %823 = vmatpush1.bf16.msra.mxu1 %v835_v3  ;;  %v866_v30 = vld [vmem:[%s1221_s0 + $0xb0] ss:$8 sps:$4 sm:$0xff]   ;;  %v869_v32 = vld [vmem:[%s1221_s0 + $0xc4] ss:$8 sps:$4 sm:$0xff]   ;;  %v871_v33 = vld [vmem:[%s1221_s0 + $0x40] ss:$8 sps:$4 sm:$0xff]  }
   0xb   :  { %336 = vmatprep.subr.bf16.mxu0 %v891_v0  ;;  %814 = vmatprep.subr.bf16.mxu1 %v891_v0  ;;  %v872_v34 = vld [vmem:[%s1221_s0 + $0xc0] ss:$8 sps:$4 sm:$0xff]   ;;  %v873_v35 = vld [vmem:[%s1221_s0 + $0x54] ss:$8 sps:$4 sm:$0xff]   ;;  %v877_v37 = vld [vmem:[%s1221_s0 + $0x50] ss:$8 sps:$4 sm:$0xff]  }
   0xc   :  { %v875_v36 = vld [vmem:[%s1221_s0 + $0xd4] ss:$8 sps:$4 sm:$0xff]   ;;  %v878_v38 = vld [vmem:[%s1221_s0 + $0xd0] ss:$8 sps:$4 sm:$0xff]   ;;  %v879_v39 = vld [vmem:[%s1221_s0 + $0x64] ss:$8 sps:$4 sm:$0xff]  }
   0xd   :  { %v881_v40 = vld [vmem:[%s1221_s0 + $0xe4] ss:$8 sps:$4 sm:$0xff]   ;;  %v883_v41 = vld [vmem:[%s1221_s0 + $0x60] ss:$8 sps:$4 sm:$0xff]   ;;  %v885_v43 = vld [vmem:[%s1221_s0 + $0x74] ss:$8 sps:$4 sm:$0xff]  }
   0xe   :  { %337 = vmatpush1.bf16.msra.mxu0 %v836_v4  ;;  %824 = vmatpush1.bf16.msra.mxu1 %v836_v4  ;;  %v884_v42 = vld [vmem:[%s1221_s0 + $0xe0] ss:$8 sps:$4 sm:$0xff]   ;;  %v887_v44 = vld [vmem:[%s1221_s0 + $0xf4] ss:$8 sps:$4 sm:$0xff]   ;;  %v889_v45 = vld [vmem:[%s1221_s0 + $0x70] ss:$8 sps:$4 sm:$0xff]  }
   0xf   :  { %338 = vmatprep.subr.bf16.mxu0 %v891_v0  ;;  %815 = vmatprep.subr.bf16.mxu1 %v891_v0  ;;  %v890_v46 = vld [vmem:[%s1221_s0 + $0xf0] ss:$8 sps:$4 sm:$0xff]   ;;  %v1058_v47 = vld [vmem:[%s1222_s2] ss:$0 sm:$0xff] }
  0x12   :  { %339 = vmatpush1.bf16.msra.mxu0 %v837_v7  ;;  %825 = vmatpush1.bf16.msra.mxu1 %v837_v7 }
  0x13   :  { %340 = vmatprep.subr.bf16.mxu0 %v891_v0  ;;  %816 = vmatprep.subr.bf16.mxu1 %v891_v0 }
  0x16   :  { %341 = vmatpush1.bf16.msra.mxu0 %v838_v8  ;;  %826 = vmatpush1.bf16.msra.mxu1 %v838_v8 }
  0x17   :  { %342 = vmatprep.subr.bf16.mxu0 %v891_v0  ;;  %817 = vmatprep.subr.bf16.mxu1 %v891_v0 }
  0x1a   :  { %343 = vmatpush1.bf16.msra.mxu0 %v839_v9  ;;  %827 = vmatpush1.bf16.msra.mxu1 %v839_v9 }
  0x1b   :  { %344 = vmatprep.subr.bf16.mxu0 %v891_v0  ;;  %818 = vmatprep.subr.bf16.mxu1 %v891_v0 }
  0x1e   :  { %345 = vmatpush1.bf16.msra.mxu0 %v840_v12  ;;  %828 = vmatpush1.bf16.msra.mxu1 %v840_v12 }
  0x1f   :  { %358 = vmatprep.subr.bf16.mxu0 %v891_v0  ;;  %819 = vmatprep.subr.bf16.mxu1 %v891_v0 }
  0x22   :  { %359 = vmatpush2.bf16.msra.mxu0 %v328_v15  ;;  %829 = vmatpush2.bf16.msra.mxu1 %v328_v15 }
  0x23   :  { %360 = vmatprep.subr.bf16.mxu0 %v891_v0  ;;  %820 = vmatprep.subr.bf16.mxu1 %v891_v0 }
  0x26   :  { %361 = vmatpush2.bf16.msra.mxu0 %v842_v16  ;;  %830 = vmatpush2.bf16.msra.mxu1 %v842_v16 }
  0x29   :  { %363 = vmatmul.mubr.bf16.vlgmr.msra.gmra.mxu0 %v843_v17  ;;  %427 = vmatmul.mubr.bf16.vlgmr.msra.gmra.mxu1 %v846_v18 }
  0x2a   :  { %732 = vmatprep.mubr.msk.bf16.mxu0 %vm274_vm0, %v849_v19  ;;  %740 = vmatprep.mubr.msk.bf16.mxu1 %vm274_vm0, %v851_v20 }
  0x31   :  { %371 = vmatmul.mubr.bf16.gmra.mxu0 %v853_v21  ;;  %435 = vmatmul.mubr.bf16.gmra.mxu1 %v854_v22 }
  0x32   :  { %733 = vmatprep.mubr.msk.bf16.mxu0 %vm274_vm0, %v855_v23  ;;  %741 = vmatprep.mubr.msk.bf16.mxu1 %vm274_vm0, %v857_v24 }
  0x39   :  { %379 = vmatmul.mubr.bf16.gmra.mxu0 %v859_v25  ;;  %443 = vmatmul.mubr.bf16.gmra.mxu1 %v860_v26 }
  0x3a   :  { %734 = vmatprep.mubr.msk.bf16.mxu0 %vm274_vm0, %v861_v27  ;;  %742 = vmatprep.mubr.msk.bf16.mxu1 %vm274_vm0, %v863_v28 }
  0x41   :  { %387 = vmatmul.mubr.bf16.gmra.mxu0 %v865_v29  ;;  %451 = vmatmul.mubr.bf16.gmra.mxu1 %v866_v30 }
  0x42   :  { %735 = vmatprep.mubr.msk.bf16.mxu0 %vm274_vm0, %v867_v31  ;;  %743 = vmatprep.mubr.msk.bf16.mxu1 %vm274_vm0, %v869_v32 }
  0x49   :  { %395 = vmatmul.mubr.bf16.gmra.mxu0 %v871_v33  ;;  %459 = vmatmul.mubr.bf16.gmra.mxu1 %v872_v34 }
  0x4a   :  { %736 = vmatprep.mubr.msk.bf16.mxu0 %vm274_vm0, %v873_v35  ;;  %744 = vmatprep.mubr.msk.bf16.mxu1 %vm274_vm0, %v875_v36 }
  0x51   :  { %403 = vmatmul.mubr.bf16.gmra.mxu0 %v877_v37  ;;  %467 = vmatmul.mubr.bf16.gmra.mxu1 %v878_v38 }
  0x52   :  { %737 = vmatprep.mubr.msk.bf16.mxu0 %vm274_vm0, %v879_v39  ;;  %745 = vmatprep.mubr.msk.bf16.mxu1 %vm274_vm0, %v881_v40 }
  0x59   :  { %411 = vmatmul.mubr.bf16.gmra.mxu0 %v883_v41  ;;  %475 = vmatmul.mubr.bf16.gmra.mxu1 %v884_v42 }
  0x5a   :  { %738 = vmatprep.mubr.msk.bf16.mxu0 %vm274_vm0, %v885_v43  ;;  %746 = vmatprep.mubr.msk.bf16.mxu1 %vm274_vm0, %v887_v44 }
  0x61   :  { %419 = vmatmul.mubr.bf16.gmra.mxu0 %v889_v45  ;;  %483 = vmatmul.mubr.bf16.gmra.mxu1 %v890_v46 }
  0xe9   :  { %v364_v48 = vpop.f32.mrf.mxu0  ;;  %v428_v49 = vpop.f32.mrf.mxu1 }
  0xea   :  { %v365_v50 = vadd.f32 %v1058_v47, %v364_v48  ;;  %v429_v51 = vadd.f32 %v1058_v47, %v428_v49 }
  0xeb   :  { %v366_v52 = vpop.f32.mrf.mxu0  ;;  %v430_v53 = vpop.f32.mrf.mxu1 }
  0xec   :  { %v491_v54 = vmax.f32 %v365_v50, 0.0  ;;  %v507_v55 = vmax.f32 %v429_v51, 0.0 }
  0xed   :  { %v367_v56 = vpop.f32.mrf.mxu0  ;;  %v431_v57 = vpop.f32.mrf.mxu1 }
  0xee   :  { %v779_v58 = vpack.c.bf16 %v491_v54, %v491_v54  ;;  %v795_v59 = vpack.c.bf16 %v507_v55, %v507_v55  ;;  %v368_v60 = vadd.f32 %v1058_v47, %v367_v56  ;;  %v432_v61 = vadd.f32 %v1058_v47, %v431_v57 }
  0xef   :  { %v369_v62 = vpop.f32.mrf.mxu0  ;;  %v433_v63 = vpop.f32.mrf.mxu1 }
  0xf0   :  { %652 = vst.msk [vmem:[%s1223_s3] sm:$0xf] %vm651_vm3, %v779_v58  ;;  %668 = vst.msk [vmem:[%s1223_s3 + $0x40] sm:$0xf] %vm651_vm3, %v795_v59  ;;  %v492_v0 = vmax.f32 %v368_v60, 0.0  ;;  %v508_v1 = vmax.f32 %v432_v61, 0.0 }
  0xf1   :  { %v372_v2 = vpop.f32.mrf.mxu0  ;;  %v436_v3 = vpop.f32.mrf.mxu1 }
  0xf2   :  { %v780_v4 = vpack.c.bf16 %v492_v0, %v492_v0  ;;  %v796_v5 = vpack.c.bf16 %v508_v1, %v508_v1  ;;  %v373_v6 = vadd.f32 %v1058_v47, %v372_v2  ;;  %v437_v7 = vadd.f32 %v1058_v47, %v436_v3 }
  0xf3   :  { %v374_v8 = vpop.f32.mrf.mxu0  ;;  %v438_v9 = vpop.f32.mrf.mxu1 }
  0xf4   :  { %653 = vst.msk [vmem:[%s1223_s3 + $0x4] sm:$0xf] %vm651_vm3, %v780_v4  ;;  %669 = vst.msk [vmem:[%s1223_s3 + $0x44] sm:$0xf] %vm651_vm3, %v796_v5  ;;  %v493_v10 = vmax.f32 %v373_v6, 0.0  ;;  %v509_v11 = vmax.f32 %v437_v7, 0.0 }
  0xf5   :  { %v375_v12 = vpop.f32.mrf.mxu0  ;;  %v439_v13 = vpop.f32.mrf.mxu1 }
  0xf6   :  { %v781_v14 = vpack.c.bf16 %v493_v10, %v493_v10  ;;  %v797_v15 = vpack.c.bf16 %v509_v11, %v509_v11  ;;  %v376_v16 = vadd.f32 %v1058_v47, %v375_v12  ;;  %v440_v17 = vadd.f32 %v1058_v47, %v439_v13 }
  0xf7   :  { %v377_v18 = vpop.f32.mrf.mxu0  ;;  %v441_v19 = vpop.f32.mrf.mxu1 }
  0xf8   :  { %654 = vst.msk [vmem:[%s1223_s3 + $0x8] sm:$0xf] %vm651_vm3, %v781_v14  ;;  %670 = vst.msk [vmem:[%s1223_s3 + $0x48] sm:$0xf] %vm651_vm3, %v797_v15  ;;  %v494_v20 = vmax.f32 %v376_v16, 0.0  ;;  %v510_v21 = vmax.f32 %v440_v17, 0.0 }
  0xf9   :  { %v380_v22 = vpop.f32.mrf.mxu0  ;;  %v444_v23 = vpop.f32.mrf.mxu1 }
  0xfa   :  { %v782_v24 = vpack.c.bf16 %v494_v20, %v494_v20  ;;  %v798_v25 = vpack.c.bf16 %v510_v21, %v510_v21  ;;  %v381_v26 = vadd.f32 %v1058_v47, %v380_v22  ;;  %v445_v27 = vadd.f32 %v1058_v47, %v444_v23 }
  0xfb   :  { %v382_v28 = vpop.f32.mrf.mxu0  ;;  %v446_v29 = vpop.f32.mrf.mxu1 }
  0xfc   :  { %655 = vst.msk [vmem:[%s1223_s3 + $0xc] sm:$0xf] %vm651_vm3, %v782_v24  ;;  %671 = vst.msk [vmem:[%s1223_s3 + $0x4c] sm:$0xf] %vm651_vm3, %v798_v25  ;;  %v495_v30 = vmax.f32 %v381_v26, 0.0  ;;  %v511_v31 = vmax.f32 %v445_v27, 0.0 }
  0xfd   :  { %v383_v32 = vpop.f32.mrf.mxu0  ;;  %v447_v33 = vpop.f32.mrf.mxu1 }
  0xfe   :  { %v783_v34 = vpack.c.bf16 %v495_v30, %v495_v30  ;;  %v799_v35 = vpack.c.bf16 %v511_v31, %v511_v31  ;;  %v384_v36 = vadd.f32 %v1058_v47, %v383_v32  ;;  %v448_v37 = vadd.f32 %v1058_v47, %v447_v33 }
  0xff   :  { %v385_v38 = vpop.f32.mrf.mxu0  ;;  %v449_v39 = vpop.f32.mrf.mxu1 }
 0x100   :  { %656 = vst.msk [vmem:[%s1223_s3 + $0x10] sm:$0xf] %vm651_vm3, %v783_v34  ;;  %672 = vst.msk [vmem:[%s1223_s3 + $0x50] sm:$0xf] %vm651_vm3, %v799_v35  ;;  %v496_v40 = vmax.f32 %v384_v36, 0.0  ;;  %v512_v41 = vmax.f32 %v448_v37, 0.0 }
 0x101   :  { %v388_v42 = vpop.f32.mrf.mxu0  ;;  %v452_v43 = vpop.f32.mrf.mxu1 }
 0x102   :  { %v784_v44 = vpack.c.bf16 %v496_v40, %v496_v40  ;;  %v800_v45 = vpack.c.bf16 %v512_v41, %v512_v41  ;;  %v389_v46 = vadd.f32 %v1058_v47, %v388_v42  ;;  %v453_v48 = vadd.f32 %v1058_v47, %v452_v43 }
 0x103   :  { %v390_v49 = vpop.f32.mrf.mxu0  ;;  %v454_v50 = vpop.f32.mrf.mxu1 }
 0x104   :  { %657 = vst.msk [vmem:[%s1223_s3 + $0x14] sm:$0xf] %vm651_vm3, %v784_v44  ;;  %673 = vst.msk [vmem:[%s1223_s3 + $0x54] sm:$0xf] %vm651_vm3, %v800_v45  ;;  %v497_v51 = vmax.f32 %v389_v46, 0.0  ;;  %v513_v52 = vmax.f32 %v453_v48, 0.0 }
 0x105   :  { %v391_v53 = vpop.f32.mrf.mxu0  ;;  %v455_v54 = vpop.f32.mrf.mxu1 }
 0x106   :  { %v785_v55 = vpack.c.bf16 %v497_v51, %v497_v51  ;;  %v801_v56 = vpack.c.bf16 %v513_v52, %v513_v52  ;;  %v392_v57 = vadd.f32 %v1058_v47, %v391_v53  ;;  %v456_v58 = vadd.f32 %v1058_v47, %v455_v54 }
 0x107   :  { %v393_v59 = vpop.f32.mrf.mxu0  ;;  %v457_v60 = vpop.f32.mrf.mxu1 }
 0x108   :  { %658 = vst.msk [vmem:[%s1223_s3 + $0x18] sm:$0xf] %vm651_vm3, %v785_v55  ;;  %674 = vst.msk [vmem:[%s1223_s3 + $0x58] sm:$0xf] %vm651_vm3, %v801_v56  ;;  %v498_v61 = vmax.f32 %v392_v57, 0.0  ;;  %v514_v62 = vmax.f32 %v456_v58, 0.0 }
 0x109   :  { %v396_v63 = vpop.f32.mrf.mxu0  ;;  %v460_v0 = vpop.f32.mrf.mxu1 }
 0x10a   :  { %v786_v1 = vpack.c.bf16 %v498_v61, %v498_v61  ;;  %v802_v2 = vpack.c.bf16 %v514_v62, %v514_v62  ;;  %v397_v3 = vadd.f32 %v1058_v47, %v396_v63  ;;  %v461_v4 = vadd.f32 %v1058_v47, %v460_v0 }
 0x10b   :  { %v398_v5 = vpop.f32.mrf.mxu0  ;;  %v462_v6 = vpop.f32.mrf.mxu1 }
 0x10c   :  { %659 = vst.msk [vmem:[%s1223_s3 + $0x1c] sm:$0xf] %vm651_vm3, %v786_v1  ;;  %675 = vst.msk [vmem:[%s1223_s3 + $0x5c] sm:$0xf] %vm651_vm3, %v802_v2  ;;  %v499_v7 = vmax.f32 %v397_v3, 0.0  ;;  %v515_v8 = vmax.f32 %v461_v4, 0.0 }
 0x10d   :  { %v399_v9 = vpop.f32.mrf.mxu0  ;;  %v463_v10 = vpop.f32.mrf.mxu1 }
 0x10e   :  { %v787_v11 = vpack.c.bf16 %v499_v7, %v499_v7  ;;  %v803_v12 = vpack.c.bf16 %v515_v8, %v515_v8  ;;  %v400_v13 = vadd.f32 %v1058_v47, %v399_v9  ;;  %v464_v14 = vadd.f32 %v1058_v47, %v463_v10 }
 0x10f   :  { %v401_v15 = vpop.f32.mrf.mxu0  ;;  %v465_v16 = vpop.f32.mrf.mxu1 }
 0x110   :  { %660 = vst.msk [vmem:[%s1223_s3 + $0x20] sm:$0xf] %vm651_vm3, %v787_v11  ;;  %676 = vst.msk [vmem:[%s1223_s3 + $0x60] sm:$0xf] %vm651_vm3, %v803_v12  ;;  %v500_v17 = vmax.f32 %v400_v13, 0.0  ;;  %v516_v18 = vmax.f32 %v464_v14, 0.0 }
 0x111   :  { %v404_v19 = vpop.f32.mrf.mxu0  ;;  %v468_v20 = vpop.f32.mrf.mxu1 }
 0x112   :  { %v788_v21 = vpack.c.bf16 %v500_v17, %v500_v17  ;;  %v804_v22 = vpack.c.bf16 %v516_v18, %v516_v18  ;;  %v405_v23 = vadd.f32 %v1058_v47, %v404_v19  ;;  %v469_v24 = vadd.f32 %v1058_v47, %v468_v20 }
 0x113   :  { %v406_v25 = vpop.f32.mrf.mxu0  ;;  %v470_v26 = vpop.f32.mrf.mxu1 }
 0x114   :  { %661 = vst.msk [vmem:[%s1223_s3 + $0x24] sm:$0xf] %vm651_vm3, %v788_v21  ;;  %677 = vst.msk [vmem:[%s1223_s3 + $0x64] sm:$0xf] %vm651_vm3, %v804_v22  ;;  %v501_v27 = vmax.f32 %v405_v23, 0.0  ;;  %v517_v28 = vmax.f32 %v469_v24, 0.0 }
 0x115   :  { %v407_v29 = vpop.f32.mrf.mxu0  ;;  %v471_v30 = vpop.f32.mrf.mxu1 }
 0x116   :  { %v789_v31 = vpack.c.bf16 %v501_v27, %v501_v27  ;;  %v805_v32 = vpack.c.bf16 %v517_v28, %v517_v28  ;;  %v408_v33 = vadd.f32 %v1058_v47, %v407_v29  ;;  %v472_v34 = vadd.f32 %v1058_v47, %v471_v30 }
 0x117   :  { %v409_v35 = vpop.f32.mrf.mxu0  ;;  %v473_v36 = vpop.f32.mrf.mxu1 }
 0x118   :  { %662 = vst.msk [vmem:[%s1223_s3 + $0x28] sm:$0xf] %vm651_vm3, %v789_v31  ;;  %678 = vst.msk [vmem:[%s1223_s3 + $0x68] sm:$0xf] %vm651_vm3, %v805_v32  ;;  %v502_v37 = vmax.f32 %v408_v33, 0.0  ;;  %v518_v38 = vmax.f32 %v472_v34, 0.0 }
 0x119   :  { %v412_v39 = vpop.f32.mrf.mxu0  ;;  %v476_v40 = vpop.f32.mrf.mxu1 }
 0x11a   :  { %v790_v41 = vpack.c.bf16 %v502_v37, %v502_v37  ;;  %v806_v42 = vpack.c.bf16 %v518_v38, %v518_v38  ;;  %v413_v43 = vadd.f32 %v1058_v47, %v412_v39  ;;  %v477_v44 = vadd.f32 %v1058_v47, %v476_v40 }
 0x11b   :  { %v414_v45 = vpop.f32.mrf.mxu0  ;;  %v478_v46 = vpop.f32.mrf.mxu1 }
 0x11c   :  { %663 = vst.msk [vmem:[%s1223_s3 + $0x2c] sm:$0xf] %vm651_vm3, %v790_v41  ;;  %679 = vst.msk [vmem:[%s1223_s3 + $0x6c] sm:$0xf] %vm651_vm3, %v806_v42  ;;  %v503_v48 = vmax.f32 %v413_v43, 0.0  ;;  %v519_v49 = vmax.f32 %v477_v44, 0.0 }
 0x11d   :  { %v415_v50 = vpop.f32.mrf.mxu0  ;;  %v479_v51 = vpop.f32.mrf.mxu1 }
 0x11e   :  { %v791_v52 = vpack.c.bf16 %v503_v48, %v503_v48  ;;  %v807_v53 = vpack.c.bf16 %v519_v49, %v519_v49  ;;  %v416_v54 = vadd.f32 %v1058_v47, %v415_v50  ;;  %v480_v55 = vadd.f32 %v1058_v47, %v479_v51 }
 0x11f   :  { %v417_v56 = vpop.f32.mrf.mxu0  ;;  %v481_v57 = vpop.f32.mrf.mxu1 }
 0x120   :  { %664 = vst.msk [vmem:[%s1223_s3 + $0x30] sm:$0xf] %vm651_vm3, %v791_v52  ;;  %680 = vst.msk [vmem:[%s1223_s3 + $0x70] sm:$0xf] %vm651_vm3, %v807_v53  ;;  %v504_v58 = vmax.f32 %v416_v54, 0.0  ;;  %v520_v59 = vmax.f32 %v480_v55, 0.0 }
 0x121   :  { %v420_v60 = vpop.f32.mrf.mxu0  ;;  %v484_v61 = vpop.f32.mrf.mxu1 }
 0x122   :  { %v792_v62 = vpack.c.bf16 %v504_v58, %v504_v58  ;;  %v808_v63 = vpack.c.bf16 %v520_v59, %v520_v59  ;;  %v421_v0 = vadd.f32 %v1058_v47, %v420_v60  ;;  %v485_v1 = vadd.f32 %v1058_v47, %v484_v61 }
 0x123   :  { %v422_v2 = vpop.f32.mrf.mxu0  ;;  %v486_v3 = vpop.f32.mrf.mxu1 }
 0x124   :  { %665 = vst.msk [vmem:[%s1223_s3 + $0x34] sm:$0xf] %vm651_vm3, %v792_v62  ;;  %681 = vst.msk [vmem:[%s1223_s3 + $0x74] sm:$0xf] %vm651_vm3, %v808_v63  ;;  %v505_v4 = vmax.f32 %v421_v0, 0.0  ;;  %v521_v5 = vmax.f32 %v485_v1, 0.0 }
 0x125   :  { %v423_v6 = vpop.f32.mrf.mxu0  ;;  %v487_v7 = vpop.f32.mrf.mxu1 }
 0x126   :  { %v793_v8 = vpack.c.bf16 %v505_v4, %v505_v4  ;;  %v809_v9 = vpack.c.bf16 %v521_v5, %v521_v5  ;;  %v424_v10 = vadd.f32 %v1058_v47, %v423_v6  ;;  %v488_v11 = vadd.f32 %v1058_v47, %v487_v7 }
 0x127   :  { %v425_v12 = vpop.f32.mrf.mxu0  ;;  %v489_v13 = vpop.f32.mrf.mxu1 }
 0x128   :  { %666 = vst.msk [vmem:[%s1223_s3 + $0x38] sm:$0xf] %vm651_vm3, %v793_v8  ;;  %682 = vst.msk [vmem:[%s1223_s3 + $0x78] sm:$0xf] %vm651_vm3, %v809_v9  ;;  %v506_v14 = vmax.f32 %v424_v10, 0.0  ;;  %v522_v15 = vmax.f32 %v488_v11, 0.0 }
 0x12a   :  { %v794_v16 = vpack.c.bf16 %v506_v14, %v506_v14  ;;  %v810_v17 = vpack.c.bf16 %v522_v15, %v522_v15 }
 0x12c   :  { %667 = vst.msk [vmem:[%s1223_s3 + $0x3c] sm:$0xf] %vm651_vm3, %v794_v16  ;;  %683 = vst.msk [vmem:[%s1223_s3 + $0x7c] sm:$0xf] %vm651_vm3, %v810_v17 }

</bundles_post_ra>
